<compile_context>
chip_gen: v7x
topology: tpu7x:2x2x1
jax: 0.10.0
libtpu: 0.0.40
codegen_flags: <defaults>
</compile_context>

<pallas_src>
import functools

import jax
import jax.numpy as jnp
from jax import lax
from jax.experimental import pallas as pl
from jax.experimental.pallas import tpu as pltpu

LANES = 128


def _round_up(x, m):
    return (x + m - 1) // m * m


# ----------------------------- Pallas kernel --------------------------------


def _fused_resblock_kernel(x_ref, w1_ref, w2_ref, *rest,
                           K, Kq, pad2, L1, Cout, Cin_sc,
                           sc_row_off, sc_lane_off, OFF, has_projection):
    """One batch sample per grid step.

    x_ref   : (1, Lx, Cg)     f32  zero-padded, stride-grouped x rows
    w1_ref  : (Kq, Cg, Cpad)  bf16 conv1 tap weights (bn1 scale folded)
    w2_ref  : (K, Cpad, Cpad) bf16 conv2 tap weights (bn2 scale folded)
    [ws_ref]: (Cin_sc, Cpad)  bf16 shortcut 1x1 weight (projection only)
    shifts  : (8, Cpad)       f32  row0=shift1, row1=shift2, row2=shift_sc
    o_ref   : (1, L1, Cout)   f32  output (no lane padding written to HBM)
    out1_scr: (Lscr, Cpad)    bf16 VMEM scratch: out1 with zero halo rows
    """
    if has_projection:
        ws_ref, shifts_ref, o_ref, out1_scr = rest
    else:
        shifts_ref, o_ref, out1_scr = rest

    Cpad = w2_ref.shape[1]

    # Load the (already zero-padded, stride-grouped) x rows once: f32 so the
    # identity shortcut stays exact; cast to bf16 only at the MXU boundary.
    xrows = x_ref[0]                                        # (Lx, Cg) f32

    # ---- conv1 -> bn1 -> relu: Kq shifted-window matmuls (contiguous taps) --
    acc1 = jnp.zeros((L1, Cpad), jnp.float32)
    for q in range(Kq):
        tap = xrows[q:q + L1, :].astype(jnp.bfloat16)       # (L1, Cg)
        acc1 = acc1 + jnp.dot(tap, w1_ref[q],
                              preferred_element_type=jnp.float32)
    out1 = jnp.maximum(acc1 + shifts_ref[pl.ds(0, 1), :], 0.0)

    # Stage out1 (bf16) at an 8-sublane-aligned interior offset; zero only the
    # halo rows, every step (safe under megacore grid splitting, tiny stores).
    out1_scr[pl.ds(OFF, L1), :] = out1.astype(jnp.bfloat16)
    if pad2 > 0:
        zrow = jnp.zeros((pad2, Cpad), dtype=out1_scr.dtype)
        out1_scr[pl.ds(OFF - pad2, pad2), :] = zrow
        out1_scr[pl.ds(OFF + L1, pad2), :] = zrow

    # ---- conv2 -> bn2: K shifted-window matmuls off the bf16 scratch -------
    acc2 = jnp.zeros((L1, Cpad), jnp.float32)
    for k in range(K):
        tap = out1_scr[pl.ds(OFF - pad2 + k, L1), :]        # bf16, no cast
        acc2 = acc2 + jnp.dot(tap, w2_ref[k],
                              preferred_element_type=jnp.float32)
    y = acc2 + shifts_ref[pl.ds(1, 1), :]

    # ---- shortcut + final ReLU ----------------------------------------------
    sc_rows = xrows[sc_row_off:sc_row_off + L1,
                    sc_lane_off:sc_lane_off + Cin_sc]       # (L1, Cin_sc) f32
    if has_projection:
        sc = jnp.dot(sc_rows.astype(jnp.bfloat16), ws_ref[...],
                     preferred_element_type=jnp.float32)
        sc = sc + shifts_ref[pl.ds(2, 1), :]
        o_ref[0] = jnp.maximum(y + sc, 0.0)[:, :Cout]
    else:
        # identity shortcut: exact f32 add, no matmul, no ws residency
        o_ref[0] = jnp.maximum(y[:, :Cout] + sc_rows, 0.0)


# ----------------------------- JAX glue --------------------------------------


def _fold_bn(conv_bias, gamma, beta, mean, var, eps=1e-5):
    scale = gamma / jnp.sqrt(var + eps)
    shift = beta + (conv_bias - mean) * scale
    return scale, shift


def _pad_lanes(a, cpad):
    pad = cpad - a.shape[-1]
    if pad:
        a = jnp.pad(a, [(0, 0)] * (a.ndim - 1) + [(0, pad)])
    return a


def init_residual_block_params(key, in_channels, out_channels,
                               kernel_size=3, stride=1):
    keys = jax.random.split(key, 6)

    def conv_init(k, cout, cin, ksz):
        fan_in = cin * ksz
        bound = 1.0 / jnp.sqrt(fan_in)
        w = jax.random.uniform(k, (cout, cin, ksz), jnp.float32, -bound, bound)
        b = jax.random.uniform(jax.random.fold_in(k, 1), (cout,),
                               jnp.float32, -bound, bound)
        return w, b

    def bn_init(k, c):
        # synthetic (deterministic) running stats so the BN path is exercised
        return dict(
            gamma=1.0 + 0.1 * jax.random.normal(k, (c,), jnp.float32),
            beta=0.05 * jax.random.normal(jax.random.fold_in(k, 1), (c,), jnp.float32),
            mean=0.1 * jax.random.normal(jax.random.fold_in(k, 2), (c,), jnp.float32),
            var=1.0 + 0.2 * jax.random.uniform(jax.random.fold_in(k, 3), (c,), jnp.float32),
        )

    params = {}
    params["conv1_w"], params["conv1_b"] = conv_init(keys[0], out_channels, in_channels, kernel_size)
    params["bn1"] = bn_init(keys[1], out_channels)
    params["conv2_w"], params["conv2_b"] = conv_init(keys[2], out_channels, out_channels, kernel_size)
    params["bn2"] = bn_init(keys[3], out_channels)
    if stride != 1 or in_channels != out_channels:
        params["convs_w"], params["convs_b"] = conv_init(keys[4], out_channels, in_channels, 1)
        params["bns"] = bn_init(keys[5], out_channels)
    return params


def residual_block_forward(params, x, stride=1, kernel_size=3, padding=1):
    """x: (N, Cin, L) float32  ->  (N, Cout, L_out) float32"""
    N, Cin, L = x.shape
    Cout = params["conv1_w"].shape[0]
    K, s, p = kernel_size, stride, padding
    assert 2 * p == K - 1, "residual add requires 'same' conv padding"
    L1 = (L + 2 * p - K) // s + 1
    Cpad = _round_up(max(Cout, LANES), LANES)
    Kq = -(-K // s)                     # conv1 taps after stride-grouping
    Cg = s * Cin                        # grouped input channels (lanes)
    Lx = L1 - 1 + Kq                    # grouped rows needed per sample
    has_projection = "convs_w" in params

    # ---- x: zero-pad (halo folded in) and group `s` time steps into lanes ---
    xt = jnp.transpose(x, (0, 2, 1))                         # (N, L, Cin)
    Lp_rows = Lx * s
    back = Lp_rows - p - L
    if back >= 0:
        xp = jnp.pad(xt, ((0, 0), (p, back), (0, 0)))
    else:
        xp = jnp.pad(xt, ((0, 0), (p, 0), (0, 0)))[:, :Lp_rows, :]
    xg = xp.reshape(N, Lx, Cg).astype(jnp.float32)           # single x copy

    # ---- conv1 weights: bn1 scale folded, regrouped per stride, per tap ----
    s1, sh1 = _fold_bn(params["conv1_b"], **params["bn1"])
    w1 = params["conv1_w"] * s1[:, None, None]               # (Cout, Cin, K)
    w1 = jnp.transpose(w1, (2, 1, 0))                        # (K, Cin, Cout)
    w1 = jnp.pad(w1, ((0, Kq * s - K), (0, 0), (0, 0)))
    w1g = w1.reshape(Kq, s, Cin, Cout).reshape(Kq, Cg, Cout)
    w1g = _pad_lanes(w1g, Cpad).astype(jnp.bfloat16)

    # ---- conv2 weights: per-tap (K, Cpad, Cpad), bn2 scale folded -----------
    s2, sh2 = _fold_bn(params["conv2_b"], **params["bn2"])
    w2 = params["conv2_w"] * s2[:, None, None]               # (Cout, Cout, K)
    w2 = jnp.transpose(w2, (2, 1, 0))                        # (K, Cin2, Cout)
    w2 = _pad_lanes(w2, Cpad)
    w2 = jnp.pad(w2, ((0, 0), (0, Cpad - Cout), (0, 0))).astype(jnp.bfloat16)

    # ---- shortcut ------------------------------------------------------------
    if has_projection:
        ss, shs = _fold_bn(params["convs_b"], **params["bns"])
        ws = params["convs_w"].reshape(Cout, Cin).T * ss[None, :]
        ws = _pad_lanes(ws, Cpad).astype(jnp.bfloat16)
    else:
        shs = jnp.zeros((Cout,), jnp.float32)
        ws = None

    shifts = jnp.zeros((8, Cpad), jnp.float32)
    shifts = shifts.at[0, :Cout].set(sh1)
    shifts = shifts.at[1, :Cout].set(sh2)
    shifts = shifts.at[2, :Cout].set(shs)

    pad2 = p                                  # conv2: stride 1, same padding
    OFF = _round_up(pad2, 8)                  # aligned interior store offset
    Lscr = _round_up(OFF + L1 + pad2, 8)

    kernel = functools.partial(
        _fused_resblock_kernel,
        K=K, Kq=Kq, pad2=pad2, L1=L1, Cout=Cout, Cin_sc=Cin,
        sc_row_off=p // s, sc_lane_off=(p % s) * Cin,
        OFF=OFF, has_projection=has_projection)

    in_specs = [
        pl.BlockSpec((1, Lx, Cg), lambda n: (n, 0, 0)),       # x rows (per sample)
        pl.BlockSpec((Kq, Cg, Cpad), lambda n: (0, 0, 0)),    # w1 taps (resident)
        pl.BlockSpec((K, Cpad, Cpad), lambda n: (0, 0, 0)),   # w2 taps (resident)
    ]
    args = [xg, w1g, w2]
    if has_projection:
        in_specs.append(pl.BlockSpec((Cin, Cpad), lambda n: (0, 0)))
        args.append(ws)
    in_specs.append(pl.BlockSpec((8, Cpad), lambda n: (0, 0)))  # packed shifts
    args.append(shifts)

    # Explicit VMEM budget (double-buffered blocks + scratch) with headroom.
    vmem_bytes = (
        2 * Lx * Cg * 4
        + 2 * Kq * Cg * Cpad * 2
        + 2 * K * Cpad * Cpad * 2
        + 2 * 8 * Cpad * 4
        + 2 * L1 * Cout * 4
        + Lscr * Cpad * 2)
    if has_projection:
        vmem_bytes += 2 * Cin * Cpad * 2
    vmem_limit = int(min(max(2 * vmem_bytes + (8 << 20), 32 << 20), 64 << 20))

    out = pl.pallas_call(
        kernel,
        out_shape=jax.ShapeDtypeStruct((N, L1, Cout), jnp.float32),
        grid=(N,),
        in_specs=in_specs,
        out_specs=pl.BlockSpec((1, L1, Cout), lambda n: (n, 0, 0)),
        scratch_shapes=[pltpu.VMEM((Lscr, Cpad), jnp.bfloat16)],
        compiler_params=pltpu.CompilerParams(
            dimension_semantics=("parallel",),
            vmem_limit_bytes=vmem_limit),
    )(*args)

    return jnp.transpose(out, (0, 2, 1))                     # back to NCL


# ----------------------------- pure-JAX reference ----------------------------


def _ref_conv1d(x, w, b, stride, padding):
    y = lax.conv_general_dilated(
        x, w, window_strides=(stride,), padding=[(padding, padding)],
        dimension_numbers=("NCH", "OIH", "NCH"))
    return y + b[None, :, None]


def _ref_bn(x, bn, eps=1e-5):
    inv = bn["gamma"] / jnp.sqrt(bn["var"] + eps)
    return (x - bn["mean"][None, :, None]) * inv[None, :, None] + bn["beta"][None, :, None]


def residual_block_reference(params, x, stride=1, kernel_size=3, padding=1):
    out = jax.nn.relu(_ref_bn(_ref_conv1d(x, params["conv1_w"], params["conv1_b"],
                                          stride, padding), params["bn1"]))
    out = _ref_bn(_ref_conv1d(out, params["conv2_w"], params["conv2_b"],
                              1, padding), params["bn2"])
    if "convs_w" in params:
        sc = _ref_bn(_ref_conv1d(x, params["convs_w"], params["convs_b"],
                                 stride, 0), params["bns"])
    else:
        sc = x
    return jax.nn.relu(out + sc)


# ----------------------------- main -------------------------------------------


if __name__ == "__main__":
    key = jax.random.PRNGKey(0)
    k1, k2, k3, k4 = jax.random.split(key, 4)

    # Case 1: projection shortcut (stride != 1, Cin != Cout)
    N, Cin, L, Cout, stride = 2, 4, 16, 8, 2
    x = jax.random.normal(k1, (N, Cin, L), jnp.float32)
    params = init_residual_block_params(k2, Cin, Cout, kernel_size=3, stride=stride)
    out = jax.block_until_ready(residual_block_forward(params, x, stride=stride))
    ref = residual_block_reference(params, x, stride=stride)
    assert out.shape == ref.shape, (out.shape, ref.shape)
    err = float(jnp.max(jnp.abs(out - ref)))
    assert jnp.allclose(out, ref, atol=2e-2, rtol=2e-2), f"proj max_err={err}"

    # Case 2: identity shortcut (stride == 1, Cin == Cout)
    Ci = 8
    x2 = jax.random.normal(k3, (N, Ci, L), jnp.float32)
    params2 = init_residual_block_params(k4, Ci, Ci, kernel_size=3, stride=1)
    out2 = jax.block_until_ready(residual_block_forward(params2, x2, stride=1))
    ref2 = residual_block_reference(params2, x2, stride=1)
    assert out2.shape == ref2.shape, (out2.shape, ref2.shape)
    err2 = float(jnp.max(jnp.abs(out2 - ref2)))
    assert jnp.allclose(out2, ref2, atol=2e-2, rtol=2e-2), f"ident max_err={err2}"

    print("KERNEL_OK")
</pallas_src>

<mosaic_0001>
module attributes {stable_mosaic.version = 11 : i64} {
  func.func @_fused_resblock_kernel(%arg0: i32, %arg1: memref<1x9x8xf32, #tpu.memory_space<vmem>>, %arg2: memref<2x8x128xbf16, #tpu.memory_space<vmem>>, %arg3: memref<3x128x128xbf16, #tpu.memory_space<vmem>>, %arg4: memref<4x128xbf16, #tpu.memory_space<vmem>>, %arg5: memref<8x128xf32, #tpu.memory_space<vmem>>, %arg6: memref<1x8x8xf32, #tpu.memory_space<vmem>>, %arg7: memref<24x128xbf16, #tpu.memory_space<vmem>>) attributes {dimension_semantics = [#tpu.dimension_semantics<parallel>], iteration_bounds = array<i64: 2>, scalar_prefetch = 0 : i64, scratch_operands = 1 : i64, tpu.core_type = #tpu.core_type<tc>, window_params = [{transform_indices = @transform_0, window_bounds = array<i64: 1, 9, 8>}, {pipeline_mode = #tpu.pipeline_mode<synchronous>, transform_indices = @transform_1, window_bounds = array<i64: 2, 8, 128>}, {pipeline_mode = #tpu.pipeline_mode<synchronous>, transform_indices = @transform_2, window_bounds = array<i64: 3, 128, 128>}, {pipeline_mode = #tpu.pipeline_mode<synchronous>, transform_indices = @transform_3, window_bounds = array<i64: 4, 128>}, {pipeline_mode = #tpu.pipeline_mode<synchronous>, transform_indices = @transform_4, window_bounds = array<i64: 8, 128>}, {transform_indices = @transform_5, window_bounds = array<i64: 1, 8, 8>}]} {
    %c0 = arith.constant 0 : index
    %c0_0 = arith.constant 0 : index
    %c0_1 = arith.constant 0 : index
    %0 = vector.load %arg1[%c0, %c0_0, %c0_1] : memref<1x9x8xf32, #tpu.memory_space<vmem>>, vector<1x9x8xf32>
    %1 = vector.shape_cast %0 : vector<1x9x8xf32> to vector<9x8xf32>
    %cst = arith.constant 0.000000e+00 : f32
    %2 = vector.broadcast %cst : f32 to vector<8x128xf32>
    %3 = vector.extract_strided_slice %1 {offsets = [0, 0], sizes = [8, 8], strides = [1, 1]} : vector<9x8xf32> to vector<8x8xf32>
    %4 = arith.truncf %3 : vector<8x8xf32> to vector<8x8xbf16>
    %c0_2 = arith.constant 0 : index
    %c0_3 = arith.constant 0 : index
    %c0_4 = arith.constant 0 : index
    %5 = vector.load %arg2[%c0_2, %c0_3, %c0_4] : memref<2x8x128xbf16, #tpu.memory_space<vmem>>, vector<1x8x128xbf16>
    %6 = vector.shape_cast %5 : vector<1x8x128xbf16> to vector<8x128xbf16>
    %cst_5 = arith.constant dense<0.000000e+00> : vector<8x128xf32>
    %7 = tpu.matmul %4, %6, %cst_5 {dimension_numbers = #tpu.dot_dimension_numbers<[1], [0], [0], [1], [0, 0, 1, 1], [], []>} : vector<8x8xbf16>, vector<8x128xbf16>, vector<8x128xf32> -> vector<8x128xf32>
    %8 = arith.addf %2, %7 : vector<8x128xf32>
    %9 = vector.extract_strided_slice %1 {offsets = [1, 0], sizes = [8, 8], strides = [1, 1]} : vector<9x8xf32> to vector<8x8xf32>
    %10 = arith.truncf %9 : vector<8x8xf32> to vector<8x8xbf16>
    %c1 = arith.constant 1 : index
    %c0_6 = arith.constant 0 : index
    %c0_7 = arith.constant 0 : index
    %11 = vector.load %arg2[%c1, %c0_6, %c0_7] : memref<2x8x128xbf16, #tpu.memory_space<vmem>>, vector<1x8x128xbf16>
    %12 = vector.shape_cast %11 : vector<1x8x128xbf16> to vector<8x128xbf16>
    %cst_8 = arith.constant dense<0.000000e+00> : vector<8x128xf32>
    %13 = tpu.matmul %10, %12, %cst_8 {dimension_numbers = #tpu.dot_dimension_numbers<[1], [0], [0], [1], [0, 0, 1, 1], [], []>} : vector<8x8xbf16>, vector<8x128xbf16>, vector<8x128xf32> -> vector<8x128xf32>
    %14 = arith.addf %8, %13 : vector<8x128xf32>
    %c0_9 = arith.constant 0 : index
    %c0_10 = arith.constant 0 : index
    %15 = vector.load %arg5[%c0_9, %c0_10] : memref<8x128xf32, #tpu.memory_space<vmem>>, vector<1x128xf32>
    %16 = vector.broadcast %15 : vector<1x128xf32> to vector<8x128xf32>
    %17 = arith.addf %14, %16 : vector<8x128xf32>
    %cst_11 = arith.constant 0.000000e+00 : f32
    %18 = vector.broadcast %cst_11 : f32 to vector<8x128xf32>
    %19 = arith.maximumf %17, %18 : vector<8x128xf32>
    %20 = arith.truncf %19 : vector<8x128xf32> to vector<8x128xbf16>
    %c8 = arith.constant 8 : index
    %c0_12 = arith.constant 0 : index
    %21 = vector.load %arg7[%c8, %c0_12] : memref<24x128xbf16, #tpu.memory_space<vmem>>, vector<8x128xbf16>
    tpu.vector_store %arg7[%c8, %c0_12], %20 {strides = array<i32>} : memref<24x128xbf16, #tpu.memory_space<vmem>>, vector<8x128xbf16>,
    %cst_13 = arith.constant 0.000000e+00 : bf16
    %22 = vector.broadcast %cst_13 : bf16 to vector<1x128xbf16>
    %c7 = arith.constant 7 : index
    %c0_14 = arith.constant 0 : index
    %23 = vector.load %arg7[%c7, %c0_14] : memref<24x128xbf16, #tpu.memory_space<vmem>>, vector<1x128xbf16>
    tpu.vector_store %arg7[%c7, %c0_14], %22 {strides = array<i32>} : memref<24x128xbf16, #tpu.memory_space<vmem>>, vector<1x128xbf16>,
    %c16 = arith.constant 16 : index
    %c0_15 = arith.constant 0 : index
    %24 = vector.load %arg7[%c16, %c0_15] : memref<24x128xbf16, #tpu.memory_space<vmem>>, vector<1x128xbf16>
    tpu.vector_store %arg7[%c16, %c0_15], %22 {strides = array<i32>} : memref<24x128xbf16, #tpu.memory_space<vmem>>, vector<1x128xbf16>,
    %cst_16 = arith.constant 0.000000e+00 : f32
    %25 = vector.broadcast %cst_16 : f32 to vector<8x128xf32>
    %c7_17 = arith.constant 7 : index
    %c0_18 = arith.constant 0 : index
    %26 = vector.load %arg7[%c7_17, %c0_18] : memref<24x128xbf16, #tpu.memory_space<vmem>>, vector<8x128xbf16>
    %c0_19 = arith.constant 0 : index
    %c0_20 = arith.constant 0 : index
    %c0_21 = arith.constant 0 : index
    %27 = vector.load %arg3[%c0_19, %c0_20, %c0_21] : memref<3x128x128xbf16, #tpu.memory_space<vmem>>, vector<1x128x128xbf16>
    %28 = vector.shape_cast %27 : vector<1x128x128xbf16> to vector<128x128xbf16>
    %cst_22 = arith.constant dense<0.000000e+00> : vector<8x128xf32>
    %29 = tpu.matmul %26, %28, %cst_22 {dimension_numbers = #tpu.dot_dimension_numbers<[1], [0], [0], [1], [0, 0, 1, 1], [], []>} : vector<8x128xbf16>, vector<128x128xbf16>, vector<8x128xf32> -> vector<8x128xf32>
    %30 = arith.addf %25, %29 : vector<8x128xf32>
    %c8_23 = arith.constant 8 : index
    %c0_24 = arith.constant 0 : index
    %31 = vector.load %arg7[%c8_23, %c0_24] : memref<24x128xbf16, #tpu.memory_space<vmem>>, vector<8x128xbf16>
    %c1_25 = arith.constant 1 : index
    %c0_26 = arith.constant 0 : index
    %c0_27 = arith.constant 0 : index
    %32 = vector.load %arg3[%c1_25, %c0_26, %c0_27] : memref<3x128x128xbf16, #tpu.memory_space<vmem>>, vector<1x128x128xbf16>
    %33 = vector.shape_cast %32 : vector<1x128x128xbf16> to vector<128x128xbf16>
    %cst_28 = arith.constant dense<0.000000e+00> : vector<8x128xf32>
    %34 = tpu.matmul %31, %33, %cst_28 {dimension_numbers = #tpu.dot_dimension_numbers<[1], [0], [0], [1], [0, 0, 1, 1], [], []>} : vector<8x128xbf16>, vector<128x128xbf16>, vector<8x128xf32> -> vector<8x128xf32>
    %35 = arith.addf %30, %34 : vector<8x128xf32>
    %c9 = arith.constant 9 : index
    %c0_29 = arith.constant 0 : index
    %36 = vector.load %arg7[%c9, %c0_29] : memref<24x128xbf16, #tpu.memory_space<vmem>>, vector<8x128xbf16>
    %c2 = arith.constant 2 : index
    %c0_30 = arith.constant 0 : index
    %c0_31 = arith.constant 0 : index
    %37 = vector.load %arg3[%c2, %c0_30, %c0_31] : memref<3x128x128xbf16, #tpu.memory_space<vmem>>, vector<1x128x128xbf16>
    %38 = vector.shape_cast %37 : vector<1x128x128xbf16> to vector<128x128xbf16>
    %cst_32 = arith.constant dense<0.000000e+00> : vector<8x128xf32>
    %39 = tpu.matmul %36, %38, %cst_32 {dimension_numbers = #tpu.dot_dimension_numbers<[1], [0], [0], [1], [0, 0, 1, 1], [], []>} : vector<8x128xbf16>, vector<128x128xbf16>, vector<8x128xf32> -> vector<8x128xf32>
    %40 = arith.addf %35, %39 : vector<8x128xf32>
    %c1_33 = arith.constant 1 : index
    %c0_34 = arith.constant 0 : index
    %41 = vector.load %arg5[%c1_33, %c0_34] : memref<8x128xf32, #tpu.memory_space<vmem>>, vector<1x128xf32>
    %42 = vector.broadcast %41 : vector<1x128xf32> to vector<8x128xf32>
    %43 = arith.addf %40, %42 : vector<8x128xf32>
    %44 = vector.extract_strided_slice %1 {offsets = [0, 4], sizes = [8, 4], strides = [1, 1]} : vector<9x8xf32> to vector<8x4xf32>
    %45 = arith.truncf %44 : vector<8x4xf32> to vector<8x4xbf16>
    %c0_35 = arith.constant 0 : index
    %c0_36 = arith.constant 0 : index
    %46 = vector.load %arg4[%c0_35, %c0_36] : memref<4x128xbf16, #tpu.memory_space<vmem>>, vector<4x128xbf16>
    %cst_37 = arith.constant dense<0.000000e+00> : vector<8x128xf32>
    %47 = tpu.matmul %45, %46, %cst_37 {dimension_numbers = #tpu.dot_dimension_numbers<[1], [0], [0], [1], [0, 0, 1, 1], [], []>} : vector<8x4xbf16>, vector<4x128xbf16>, vector<8x128xf32> -> vector<8x128xf32>
    %c2_38 = arith.constant 2 : index
    %c0_39 = arith.constant 0 : index
    %48 = vector.load %arg5[%c2_38, %c0_39] : memref<8x128xf32, #tpu.memory_space<vmem>>, vector<1x128xf32>
    %49 = vector.broadcast %48 : vector<1x128xf32> to vector<8x128xf32>
    %50 = arith.addf %47, %49 : vector<8x128xf32>
    %51 = arith.addf %43, %50 : vector<8x128xf32>
    %cst_40 = arith.constant 0.000000e+00 : f32
    %52 = vector.broadcast %cst_40 : f32 to vector<8x128xf32>
    %53 = arith.maximumf %51, %52 : vector<8x128xf32>
    %54 = vector.extract_strided_slice %53 {offsets = [0, 0], sizes = [8, 8], strides = [1, 1]} : vector<8x128xf32> to vector<8x8xf32>
    %c0_41 = arith.constant 0 : index
    %c0_42 = arith.constant 0 : index
    %c0_43 = arith.constant 0 : index
    %55 = vector.load %arg6[%c0_41, %c0_42, %c0_43] : memref<1x8x8xf32, #tpu.memory_space<vmem>>, vector<1x8x8xf32>
    %56 = vector.shape_cast %55 : vector<1x8x8xf32> to vector<8x8xf32>
    %57 = vector.shape_cast %54 : vector<8x8xf32> to vector<1x8x8xf32>
    tpu.vector_store %arg6[%c0_41, %c0_42, %c0_43], %57 {strides = array<i32>} : memref<1x8x8xf32, #tpu.memory_space<vmem>>, vector<1x8x8xf32>,
    return
  }
  func.func @transform_0(%arg0: i32) -> (i32, i32, i32) {
    %c0_i32 = arith.constant 0 : i32
    %c0_i32_0 = arith.constant 0 : i32
    %c0_i32_1 = arith.constant 0 : i32
    return %arg0, %c0_i32, %c0_i32_0 : i32, i32, i32
  }
  func.func @transform_1(%arg0: i32) -> (i32, i32, i32) {
    %c0_i32 = arith.constant 0 : i32
    %c0_i32_0 = arith.constant 0 : i32
    %c0_i32_1 = arith.constant 0 : i32
    %c0_i32_2 = arith.constant 0 : i32
    return %c0_i32, %c0_i32_0, %c0_i32_1 : i32, i32, i32
  }
  func.func @transform_2(%arg0: i32) -> (i32, i32, i32) {
    %c0_i32 = arith.constant 0 : i32
    %c0_i32_0 = arith.constant 0 : i32
    %c0_i32_1 = arith.constant 0 : i32
    %c0_i32_2 = arith.constant 0 : i32
    return %c0_i32, %c0_i32_0, %c0_i32_1 : i32, i32, i32
  }
  func.func @transform_3(%arg0: i32) -> (i32, i32) {
    %c0_i32 = arith.constant 0 : i32
    %c0_i32_0 = arith.constant 0 : i32
    %c0_i32_1 = arith.constant 0 : i32
    return %c0_i32, %c0_i32_0 : i32, i32
  }
  func.func @transform_4(%arg0: i32) -> (i32, i32) {
    %c0_i32 = arith.constant 0 : i32
    %c0_i32_0 = arith.constant 0 : i32
    %c0_i32_1 = arith.constant 0 : i32
    return %c0_i32, %c0_i32_0 : i32, i32
  }
  func.func @transform_5(%arg0: i32) -> (i32, i32, i32) {
    %c0_i32 = arith.constant 0 : i32
    %c0_i32_0 = arith.constant 0 : i32
    %c0_i32_1 = arith.constant 0 : i32
    return %arg0, %c0_i32, %c0_i32_0 : i32, i32, i32
  }
}

</mosaic_0001>

<bundles_post_ra>
// kernel: tpu_custom_call.1
= control target key start
LH: loop header
LB: loop body
LE: loop exit
PB: predicated region body
PF: predicated region fallthrough
CT: control target
= control target key end

     0   :  { %10 = vsyncpa [#allocation4], 0  ;;  %s1445_s0 = inlined_call_operand.vmem [shape: f32[2,9,8], index: 0, kind: input, shape index: {}]   ;;  %s1446_s1 = inlined_call_operand.vmem [shape: bf16[2,8,128], index: 1, kind: input, shape index: {}]   ;;  %s1447_s2 = inlined_call_operand.hbm [shape: bf16[3,128,128], index: 2, kind: input, shape index: {}]   ;;  %s1448_s3 = inlined_call_operand.vmem [shape: bf16[4,128], index: 3, kind: input, shape index: {}]   ;;  %s1449_s4 = inlined_call_operand.vmem [shape: f32[8,128], index: 4, kind: input, shape index: {}]   ;;  %s1450_s5 = inlined_call_operand.hbm [shape: f32[2,8,8], index: 5, kind: output, shape index: {}]  }
   0x1   :  { %11 = vsyncpa [#allocation5], 0 }
   0x2   :  { %13 = vsyncpa [#allocation5 + $0x1], 0  ;;  %s1248_s18 = smov 0   ;;  %s1250_s19 = smov 0  }
   0x3   :  { %s1252_s20 = smov 0   ;;  %s1254_s21 = smov 0  }
   0x4 LB: > { %s1269_s22 = sadd.s32 4294967295, %s1209_s21   ;;  %s865_s23 = sadd.s32 4294967294, %s1209_s21   ;;  %s1209_s21 = sphi %s1254_s21, %s1466_s21   ;;  %s1205_s20 = sphi %s1252_s20, %s1465_s20   ;;  %s1201_s19 = sphi %s1250_s19, %s1464_s19   ;;  %s1197_s18 = sphi %s1248_s18, %s1463_s18  }
   0x5   : > { %s1273_s24 = sadd.s32 1, %s1209_s21   ;;  %s136_s25 = sadd.s32 1, %s1205_s20 }
   0x6   : > { %s133_s26 = ssub.s32 %s1209_s21, %s1273_s24  ;;  %p146_p0 = scmp.ne.s32.totalorder %s1205_s20, %s1201_s19 }
   0x7   : > { %p134_p1 = scmp.eq.s32.totalorder %s133_s26, 0  ;;  %p147_p2 = scmp.eq.s32.totalorder %s1269_s22, 1 }
   0x8   : > { %p152_p3 = scmp.ne.s32.totalorder %s1201_s19, %s1197_s18  ;;  %p153_p4 = scmp.eq.s32.totalorder %s865_s23, 1 }
   0x9   : > { %s1284_s27 = scalar_select %p134_p1, %s1205_s20, %s136_s25  }
   0xa   : > { %p1286_p5 = por %p147_p2, %p146_p0  ;;  %p1290_p6 = por %p153_p4, %p152_p3 }
   0xb   : > { %p866_p7 = scmp.ge.s32.totalorder %s1209_s21, 1  ;;  %p160_p8 = scmp.lt.s32.totalorder %s1209_s21, 3 }
   0xc   : > { %s1454_s28 = scalar_select %p1286_p5, 1, 0 }
   0xd   : > { %s1455_s29 = scalar_select %p1290_p6, 1, 0 }
   0xe   : > { %p1451_p9 = scmp.eq.s32.totalorder %s1269_s22, 0  ;;  %p1297_p10 = pnand %p866_p7, %p160_p8 }
   0xf   : > { %s1211_s6 = smov [#allocation3]   ;;  %s1115_s11 = scalar_lea.hbm %s1447_s2, 3072 }
  0x10   : > { %s1456_s30 = scalar_select %p1297_p10, 1, 0 }
  0x11   : > { %s175_s7 = sshll.u32 %s1211_s6, 4  ;;  %p1040_p11 = pneg %p1297_p10  ;;  %s176_s7 = int_to_ptr.vmem [resolvable:$true] %s175_s7 }
  0x12   : > { %p1116_p13 = scmp.ne.s32.totalorder %s1447_s2, %s1115_s11  ;;  %p1122_p3 = scmp.lt.u32.totalorder %s1115_s11, %s1447_s2 }
  0x13   : > { %p1305_p12 = pnand %p1451_p9, %p1040_p11 }
  0x15   : > { %p1117_p0 = pneg %p1305_p12 }
  0x17   : > { %p1118_p1 = pnand %p1117_p0, %p1116_p13 }
  0x19   : > { %p1119_p2 = pneg %p1118_p1 }
  0x1b   : > { %p1124_p4 = pnand %p1122_p3, %p1119_p2 }
  0x1d   : > { %1127 = shalt.err (!%p1124_p4)
}
  0x1e   : > { %s1128_s16 = scalar_lea.vmem %s176_s7, 3072  ;;  %p1136_p9 = scmp.lt.s32.totalorder %s176_s7, %s176_s7 }
  0x1f   : > { %p1129_p7 = scmp.ne.s32.totalorder %s176_s7, %s1128_s16  ;;  %p1137_p6 = scmp.lt.s32.totalorder %s1128_s16, %s1128_s16 }
  0x21   : > { %p1131_p8 = pnand %p1129_p7, %p1117_p0  ;;  %p1138_p5 = por %p1137_p6, %p1136_p9 }
  0x23   : > { %p1132_p11 = pneg %p1131_p8 }
  0x25   : > { %p1139_p10 = pnand %p1138_p5, %p1132_p11 }
  0x27   : > { %1142 = shalt.err (!%p1139_p10)
}
  0x28   : > { %s1212_s17 = smov 64   ;;  %s1213_s23 = smov 4  }
  0x29   : > { %1043 = dma.hbm_to_vmem [thread:$0]  (!%p1305_p12), %s1447_s2, 3072, %s176_s7, [#allocation4], %s1212_s17, %s1212_s17, %s1213_s23  }
  0x2a   : > { %p1458_p13 = scmp.ne.s32.totalorder %s1456_s30, 0 }
  0x2b   : > { %p1459_p1 = scmp.eq.s32.totalorder (!%p1458_p13), %s1269_s22, 0 }
  0x2c   : > { %205 = sbr.rel (%p1458_p13) target bundleno = 569 (0x239), region = 40 }
  0x33   : > { %1188 = dma.done.wait (%p1459_p1), [#allocation4], 3072   ;;  %p1460_p0 = pmov %p1459_p1 }
  0x34   : > { %p233_p5 = scmp.lt.s32.totalorder %s1269_s22, 1  ;;  %v1214_v0 = vmov 0.0   ;;  %vm1215_vm0 = vmmov 0   ;;  %vm257_vm1 = vcmask 1043456   ;;  %v874_v1 = vld [vmem:[%s1446_s1 + $0x4] sm:$0xf] }
  0x35   : > { %1190 = vsyncadd (%p1460_p0), [#allocation4], 4294964224  ;;  %945 = vmatprep.subr.bf16.mxu0 %v1214_v0  ;;  %947 = vmatprep.mubr.msk.bf16.mxu0 %vm1215_vm0, %v1214_v0  ;;  %v242_v3 = vld [vmem:[%s1446_s1] sm:$0xf]  ;;  %v259_v4 = vsel %vm257_vm1, %v874_v1, 0  ;;  %v1089_v8 = vld [vmem:[#allocation3 + $0x40] sm:$0xff]  }
  0x36   : > { %s234_s6 = scalar_select %p233_p5, %s1269_s22, 1  ;;  %957 = vmatprep.subr.bf16.mxu1 %v1214_v0  ;;  %973 = vmatprep.mubr.msk.bf16.mxu1 %vm1215_vm0, %v1214_v0  ;;  %vm253_vm2 = vcmask 64512   ;;  %v1090_v9 = vld [vmem:[#allocation3 + $0x48] sm:$0xff]   ;;  %v305_v12 = vsel %vm257_vm1, %v242_v3, 0  ;;  %v1091_v15 = vld [vmem:[#allocation3 + $0x50] sm:$0xff]   ;;  %v1092_v16 = vld [vmem:[#allocation3 + $0x80] sm:$0xff]  }
  0x37   : > { %946 = vmatpush3.bf16.msra.mxu0 %v259_v4  ;;  %s1216_s14 = smov 124   ;;  %958 = vmatpush3.bf16.msra.mxu1 %v1089_v8  ;;  %v1093_v17 = vld [vmem:[#allocation3 + $0x58] sm:$0xff]   ;;  %v1094_v18 = vld [vmem:[#allocation3 + $0x88] sm:$0xff]   ;;  %v1095_v19 = vld [vmem:[#allocation3 + $0x60] sm:$0xff]   ;;  %vm356_vm3 = vcmask 1043459   ;;  %vm362_vm6 = vcmask 1040384  }
  0x38   : > { %s911_s30 = sshll.u32 %s234_s6, 4  ;;  %951 = vmatprep.subr.bf16.mxu0 %v1214_v0  ;;  %959 = vmatprep.subr.bf16.mxu1 %v1214_v0  ;;  %v1096_v20 = vld [vmem:[#allocation3 + $0x90] sm:$0xff]   ;;  %v1097_v21 = vld [vmem:[#allocation3 + $0x68] sm:$0xff]   ;;  %v1098_v22 = vld [vmem:[#allocation3 + $0x98] sm:$0xff]   ;;  %vm357_vm4 = vsmask.f32 7950 }
  0x39   : > { %s237_s9 = scalar_lea.vmem %s1445_s0, %s911_s30  ;;  %v1099_v23 = vld [vmem:[#allocation3 + $0x70] sm:$0xff]   ;;  %v1100_v24 = vld [vmem:[#allocation3 + $0xa0] sm:$0xff]   ;;  %vm358_vm5 = vmand %vm356_vm3, %vm357_vm4  ;;  %vm363_vm7 = vsmask.f32 256  ;;  %vm733_vm9 = vcmask 1041408   ;;  %vm729_vm10 = vcmask 31744  }
  0x3a   : > { %v239_v2 = vld [vmem:[%s237_s9] sm:$0xff]  ;;  %v240_v5 = vld [vmem:[%s237_s9 + $0x8] sm:$0x1]  ;;  %vm364_vm8 = vmand %vm362_vm6, %vm363_vm7  ;;  %s230_s25 = sand.u32 1, %s1201_s19   ;;  %s908_s9 = sshll.u32 %s1269_s22, 7 }
  0x3b   : > { %v241_v6 = vpack.c.bf16 %v239_v2, %v239_v2  ;;  %v243_v7 = vpack.c.bf16 %v240_v5, %v239_v2  ;;  %960 = vmatpush3.bf16.msra.mxu1 %v1090_v9  ;;  %v359_v25 = vld [vmem:[#allocation2] sm:$0x8]  ;;  %v365_v26 = vld [vmem:[#allocation2 + $0x8] sm:$0x1]  ;;  %v1102_v28 = vld [vmem:[#allocation3 + $0xa8] sm:$0xff]   ;;  %s871_s30 = sshll.u32 %s230_s25, 3 }
  0x3c   : > { %961 = vmatprep.subr.bf16.mxu1 %v1214_v0  ;;  %v1101_v27 = vld [vmem:[#allocation3 + $0x78] sm:$0xff]   ;;  %v360_v29 = vsel %vm358_vm5, 0, %v359_v25  ;;  %v366_v30 = vsel %vm364_vm8, 0, %v365_v26  ;;  %v1105_v31 = vld [vmem:[#allocation3 + $0xb0] sm:$0xff]   ;;  %v1104_v46 = vld [vmem:[#allocation3] sm:$0xff]   ;;  %s232_s10 = scalar_lea.vmem [#allocation6], %s871_s30 }
  0x3d   : > { %727 = vrot.lane.b32.xlu0 %v241_v6, %s1216_s14  ;;  %v247_v10 = vshrl.u32 %v243_v7, 16  ;;  %v249_v11 = vshll.u32 %v243_v7, 16  ;;  %361 = vst [vmem:[#allocation2] sm:$0x8] %v360_v29  ;;  %367 = vst [vmem:[#allocation2 + $0x8] sm:$0x1] %v366_v30  ;;  %s1402_s14 = scalar_lea.hbm %s1450_s5, %s908_s9 }
  0x3e   : > { %v1107_v32 = vld [vmem:[#allocation3 + $0xb8] sm:$0xff]   ;;  %v877_v38 = vld [vmem:[%s1449_s4] ss:$0 sm:$0xff]  ;;  %v1106_v49 = vld [vmem:[#allocation3 + $0x8] sm:$0xff]   ;;  %s794_s11 = sshll.u32 %s232_s10, 4  ;;  %s781_s15 = scalar_lea.sflag [#allocation5], %s230_s25  ;;  %s1404_s11 = int_to_ptr.vmem [resolvable:$true] %s794_s11 }
  0x3f   : > { %v251_v13 = vrot.slane %v249_v11, 1  ;;  %962 = vmatpush3.bf16.msra.mxu1 %v1091_v15  ;;  %v720_v51 = vld [vmem:[%s1448_s3] sm:$0x3]  ;;  %v1110_v57 = vld [vmem:[#allocation3 + $0x18] sm:$0xff]   ;;  %v1111_v58 = vld [vmem:[#allocation3 + $0x20] sm:$0xff]   ;;  %s1143_s16 = scalar_lea.vmem %s1404_s11, 128 }
  0x40   : > { %963 = vmatprep.subr.bf16.mxu1 %v1214_v0  ;;  %v1108_v54 = vld [vmem:[#allocation3 + $0x10] sm:$0xff]   ;;  %v735_v56 = vsel %vm733_vm9, %v720_v51, 0  ;;  %v1112_v61 = vld [vmem:[#allocation3 + $0x28] sm:$0xff]   ;;  %v1114_v3 = vld [vmem:[#allocation3 + $0x38] sm:$0xff]   ;;  %p1144_p6 = scmp.ne.s32.totalorder %s1404_s11, %s1143_s16  ;;  %p1461_p9 = scmp.ne.s32.totalorder %s1454_s28, 0 }
  0x41   : > { %v252_v14 = vor.u32 %v251_v13, %v247_v10  ;;  %v1113_v63 = vld [vmem:[#allocation3 + $0x30] sm:$0xff]   ;;  %s1217_s22 = smov [#allocation6]  }
  0x42   : > { %v904_v11 = vld [vmem:[%s1449_s4 + $0x1] ss:$0 sm:$0xff]  ;;  %v905_v13 = vld [vmem:[%s1449_s4 + $0x2] ss:$0 sm:$0xff]  ;;  %p1145_p10 = pnand %p1144_p6, %p1461_p9  ;;  %s1147_s17 = sshll.u32 %s1217_s22, 4  ;;  %s1148_s17 = int_to_ptr.vmem [resolvable:$false] %s1147_s17 }
  0x43   : > { %948 = vmatmul.mubr.msk.bf16.vlgmr.msra.gmra.mrb[0].mxu0 %vm253_vm2, %v252_v14  ;;  %964 = vmatpush3.bf16.msra.mxu1 %v1093_v17  ;;  %s1149_s23 = scalar_lea.vmem %s1148_s17, 256  ;;  %p1150_p2 = scmp.lt.s32.totalorder %s1404_s11, %s1148_s17 }
  0x44   : > { %952 = vmatpush3.bf16.msra.mxu0 %v305_v12  ;;  %953 = vmatprep.mubr.msk.bf16.mxu0 %vm1215_vm0, %v1214_v0  ;;  %v368_v59 = vld [vmem:[#allocation2] sm:$0x8]  ;;  %p1146_p12 = pneg %p1145_p10  ;;  %p1151_p3 = scmp.lt.s32.totalorder %s1149_s23, %s1143_s16 }
  0x45   : > { %997 = vmatprep.subr.bf16.mxu0 %v1214_v0  ;;  %965 = vmatprep.subr.bf16.mxu1 %v1214_v0 }
  0x46   : > { %p1152_p4 = por %p1151_p3, %p1150_p2 }
  0x47   : > { %966 = vmatpush3.bf16.msra.mxu1 %v1095_v19 }
  0x48   : > { %967 = vmatprep.subr.bf16.mxu1 %v1214_v0  ;;  %p1153_p7 = pnand %p1152_p4, %p1146_p12 }
  0x4b   : > { %954 = vmatmul.mubr.msk.bf16.vlgmr.msra.gmra.mrb[4].mxu0 %vm253_vm2, %v241_v6  ;;  %968 = vmatpush3.bf16.msra.mxu1 %v1097_v21 }
  0x4c   : > { %1013 = vmatprep.mubr.msk.bf16.mxu0 %vm1215_vm0, %v1214_v0  ;;  %998 = vmatpush3.bf16.msra.mxu0 %v1092_v16 }
  0x4d   : > { %999 = vmatprep.subr.bf16.mxu0 %v1214_v0  ;;  %969 = vmatprep.subr.bf16.mxu1 %v1214_v0 }
  0x4f   : > { %970 = vmatpush3.bf16.msra.mxu1 %v1099_v23 }
  0x50   : > { %1000 = vmatpush3.bf16.msra.mxu0 %v1094_v18  ;;  %971 = vmatprep.subr.bf16.mxu1 %v1214_v0 }
  0x51   : > { %1001 = vmatprep.subr.bf16.mxu0 %v1214_v0 }
  0x53   : > { %972 = vmatpush3.bf16.msra.mxu1 %v1101_v27 }
  0x54   : > { %1002 = vmatpush3.bf16.msra.mxu0 %v1096_v20  ;;  %977 = vmatprep.subr.bf16.mxu1 %v1214_v0 }
  0x55   : > { %1003 = vmatprep.subr.bf16.mxu0 %v1214_v0 }
  0x58   : > { %1004 = vmatpush3.bf16.msra.mxu0 %v1098_v22 }
  0x59   : > { %1005 = vmatprep.subr.bf16.mxu0 %v1214_v0 }
  0x5c   : > { %1006 = vmatpush3.bf16.msra.mxu0 %v1100_v24 }
  0x5d   : > { %1007 = vmatprep.subr.bf16.mxu0 %v1214_v0 }
  0x60   : > { %1008 = vmatpush3.bf16.msra.mxu0 %v1102_v28 }
  0x61   : > { %1009 = vmatprep.subr.bf16.mxu0 %v1214_v0 }
  0x64   : > { %1010 = vmatpush3.bf16.msra.mxu0 %v1105_v31 }
  0x65   : > { %1011 = vmatprep.subr.bf16.mxu0 %v1214_v0 }
  0x68   : > { %1012 = vmatpush3.bf16.msra.mxu0 %v1107_v32 }
  0x69   : > { %1017 = vmatprep.subr.bf16.mxu0 %v1214_v0 }
  0xaf   : > { %v728_v60 = vpop.permute.xlu0 %727 }
 0x116   : > { %v295_v33 = vpop.f32.mrb[0].mxu0 }
 0x117   : > { %v949_v34 = vpop.f32.mrb[1].mxu0 }
 0x118   : > { %v298_v35 = vpop.f32.mrb[2].mxu0 }
 0x119   : > { %v950_v36 = vpop.f32.mrb[3].mxu0 }
 0x11e   : > { %v341_v37 = vpop.f32.mrb[4].mxu0 }
 0x11f   : > { %v342_v39 = vadd.f32 %v341_v37, %v295_v33  ;;  %v955_v40 = vpop.f32.mrb[5].mxu0 }
 0x120   : > { %v344_v41 = vpop.f32.mrb[6].mxu0 }
 0x121   : > { %v352_v42 = vadd.f32 %v877_v38, %v342_v39  ;;  %v956_v43 = vpop.f32.mrb[7].mxu0 }
 0x123   : > { %v353_v44 = vmax.f32 %v352_v42, 0.0 }
 0x125   : > { %v354_v45 = vpack.c.bf16 %v353_v44, %v353_v44 }
 0x127   : > { %355 = vst [vmem:[#allocation2 + $0x4] sm:$0xf] %v354_v45 }
 0x12e   : > { %v369_v47 = vld [vmem:[#allocation2 + $0x4] sm:$0xf] }
 0x12f   : > { %v1109_v48 = vld [vmem:[#allocation2 + $0x4] sm:$0x1f]   ;;  %974 = vmatmul.mubr.bf16.vlgmr.msra.gmra.mrb[0].mxu1 %v369_v47  ;;  %v886_v62 = vcombine.low %v368_v59, %v369_v47 }
 0x130   : > { %978 = vmatpush3.bf16.msra.mxu1 %v1104_v46  ;;  %v620_v50 = vshll.u32 %v1109_v48, 16  ;;  %993 = vmatprep.mubr.msk.bf16.mxu1 %vm1215_vm0, %v1214_v0  ;;  %v618_v52 = vshrl.u32 %v1109_v48, 16 }
 0x131   : > { %979 = vmatprep.subr.bf16.mxu1 %v1214_v0  ;;  %v497_v1 = vshrl.u32 %v886_v62, 16  ;;  %v500_v2 = vshll.u32 %v886_v62, 16 }
 0x132   : > { %v622_v53 = vrot.slane %v620_v50, 1 }
 0x133   : > { %v499_v4 = vrot.slane %v497_v1, 3  ;;  %v502_v5 = vrot.slane %v500_v2, 4 }
 0x134   : > { %980 = vmatpush3.bf16.msra.mxu1 %v1106_v49  ;;  %v623_v55 = vor.u32 %v622_v53, %v618_v52 }
 0x135   : > { %981 = vmatprep.subr.bf16.mxu1 %v1214_v0  ;;  %v503_v6 = vor.u32 %v502_v5, %v499_v4 }
 0x136   : > { %1014 = vmatmul.mubr.bf16.vlgmr.msra.gmra.mrb[8].mxu0 %v623_v55 }
 0x137   : > { %1018 = vmatpush3.bf16.msra.mxu0 %v735_v56  ;;  %1019 = vmatprep.mubr.msk.bf16.mxu0 %vm1215_vm0, %v1214_v0 }
 0x138   : > { %982 = vmatpush3.bf16.msra.mxu1 %v1108_v54 }
 0x139   : > { %983 = vmatprep.subr.bf16.mxu1 %v1214_v0 }
 0x13c   : > { %984 = vmatpush3.bf16.msra.mxu1 %v1110_v57 }
 0x13d   : > { %985 = vmatprep.subr.bf16.mxu1 %v1214_v0 }
 0x140   : > { %986 = vmatpush3.bf16.msra.mxu1 %v1111_v58 }
 0x141   : > { %987 = vmatprep.subr.bf16.mxu1 %v1214_v0 }
 0x142   : > { %1020 = vmatmul.mubr.msk.bf16.vlgmr.msra.gmra.mrb[8].mxu0 %vm729_vm10, %v728_v60 }
 0x144   : > { %988 = vmatpush3.bf16.msra.mxu1 %v1112_v61 }
 0x145   : > { %989 = vmatprep.subr.bf16.mxu1 %v1214_v0 }
 0x148   : > { %990 = vmatpush3.bf16.msra.mxu1 %v1113_v63 }
 0x149   : > { %991 = vmatprep.subr.bf16.mxu1 %v1214_v0 }
 0x14c   : > { %992 = vmatpush3.bf16.msra.mxu1 %v1114_v3 }
 0x14f   : > { %994 = vmatmul.mubr.bf16.vlgmr.msra.gmra.mrb[0].mxu1 %v503_v6 }
 0x215   : > { %v771_v7 = vpop.f32.mrb[8].mxu0 }
 0x216   : > { %v1021_v8 = vpop.f32.mrb[9].mxu0 }
 0x217   : > { %v774_v9 = vpop.f32.mrb[10].mxu0 }
 0x218   : > { %v1022_v10 = vpop.f32.mrb[11].mxu0 }
 0x222   : > { %v587_v12 = vpop.f32.mrb[0].mxu1 }
 0x223   : > { %v1023_v0 = vadd.f32 %v904_v11, %v587_v12  ;;  %v995_v14 = vpop.f32.mrb[1].mxu1 }
 0x224   : > { %v590_v15 = vpop.f32.mrb[2].mxu1 }
 0x225   : > { %v1024_v16 = vadd.f32 %v1023_v0, %v905_v13  ;;  %v996_v17 = vpop.f32.mrb[3].mxu1 }
 0x227   : > { %v1025_v18 = vadd.f32 %v1024_v16, %v771_v7 }
 0x229   : > { %v778_v19 = vmax.f32 %v1025_v18, 0.0 }
 0x22b   : > { %779 = vst.msk [vmem:[%s232_s10] sm:$0xff] %vm253_vm2, %v778_v19 }
 0x22c   : > { %1156 = shalt.err (!%p1153_p7)
}
 0x22d   : > { %s1157_s25 = scalar_lea.hbm %s1402_s14, 128  ;;  %s1161_s30 = scalar_lea.hbm %s1450_s5, 256 }
 0x22e   : > { %p1158_p8 = scmp.ne.s32.totalorder %s1402_s14, %s1157_s25  ;;  %p1162_p1 = scmp.lt.u32.totalorder %s1402_s14, %s1450_s5 }
 0x22f   : > { %p1163_p0 = scmp.lt.u32.totalorder %s1161_s30, %s1157_s25  ;;  %p1165_p6 = scmp.lt.u32.totalorder %s1157_s25, %s1402_s14 }
 0x230   : > { %p1159_p11 = pnand %p1158_p8, %p1461_p9 }
 0x231   : > { %p1164_p5 = por %p1163_p0, %p1162_p1 }
 0x232   : > { %p1160_p13 = pneg %p1159_p11 }
 0x233   : > { %p1166_p10 = por %p1165_p6, %p1164_p5 }
 0x235   : > { %p1167_p12 = pnand %p1166_p10, %p1160_p13 }
 0x237   : > { %1170 = shalt.err (!%p1167_p12)
}
 0x238   : > { %1038 = dma.vmem_to_hbm [thread:$0]  (%p1461_p9), %s1404_s11, 128, %s1402_s14, %s781_s15  }
 0x239 PF: > { %p1050_p2 = scmp.ge.s32.totalorder %s1209_s21, 2  ;;  %s806_s9 = sand.u32 1, %s1197_s18  }
 0x23a   : > { %p1462_p3 = scmp.ne.s32.totalorder %s1455_s29, 0  ;;  %s807_s10 = scalar_lea.sflag [#allocation5], %s806_s9 }
 0x23c   : > { %p1045_p4 = pnand %p1050_p2, %p1462_p3 }
 0x23e   : > { %1192 = dma.done.wait (!%p1045_p4), %s807_s10, 128  }
 0x23f   : > { %1194 = vsyncadd (!%p1045_p4), %s807_s10, 4294967168  ;;  %p16_p7 = scmp.ge.s32.totalorder %s1273_s24, 4   ;;  %s1463_s18 = smov %s1201_s19 }
 0x240   : > { %s1464_s19 = smov %s1205_s20  ;;  %s1465_s20 = smov %s1284_s27 }
 0x241   : > { %s1466_s21 = smov %s1273_s24  ;;  %18 = sbr.rel (!%p16_p7) target bundleno = 4 (0x4), region = 83 }
 0x248   :  { %812 = vsyncpa [#allocation4], 1 }
 0x249   :  { %814 = vsyncpa [#allocation4 + $0x1], 1 }
 0x24a   :  { %815 = vsyncpa [#allocation5], 1 }
 0x24b   :  { %817 = vsyncpa [#allocation5 + $0x1], 1 }

</bundles_post_ra>
